<compile_context>
chip_gen: v7x
topology: tpu7x:2x2x1
jax: 0.10.0
libtpu: 0.0.40
codegen_flags: <defaults>
</compile_context>

<pallas_src>
import functools

import jax
import jax.numpy as jnp
from jax.experimental import pallas as pl
from jax.experimental.pallas import tpu as pltpu

HIDDEN = 64
HEAD_HIDDEN = 32


def _round_up(n, m):
    return ((n + m - 1) // m) * m


def _blob_layout(input_dim):
    """Row offsets of each section inside the packed (rows, 128) blob."""
    in_pad = _round_up(max(input_dim, 8), 8)       # matmul K for layer 1
    o1 = _round_up(in_pad, 16)                     # W2 start (bf16 tile aligned)
    o2 = o1 + HIDDEN                               # fused head layer-1 start
    o3 = o2 + HIDDEN                               # folded Q head start
    ob = o3 + HIDDEN                               # bias block start
    n_rows = ob + 16                               # keep total a multiple of 16
    return in_pad, o1, o2, o3, ob, n_rows


# ----------------------------------------------------------------------------
# Kernel
# ----------------------------------------------------------------------------
def dueling_q_kernel(x_ref, p_ref, q_ref, *, in_pad, o1, o2, o3, ob, out_dim):
    """One grid step: (TB, in_pad) states -> (TB, out_dim) Q-values."""
    H = HIDDEN

    x = x_ref[...].astype(jnp.bfloat16)                     # (TB, in_pad) bf16

    # Static, sublane-aligned sub-views of the single bf16 parameter blob.
    w1 = p_ref[0:in_pad, 0:H]                               # (in_pad, 64)
    w2 = p_ref[o1:o1 + H, 0:H]                              # (64, 64)
    wh1 = p_ref[o2:o2 + H, 0:H]                             # (64, 64) = [wv1 | wa1]
    wq = p_ref[o3:o3 + H, :]                                # (64, 128) folded Q head
    bias = p_ref[ob:ob + 8, :].astype(jnp.float32)          # (8, 128) biases (f32 math)
    b1 = bias[0:1, 0:H]
    b2 = bias[1:2, 0:H]
    bh1 = bias[2:3, 0:H]
    bq = bias[3:4, :]                                       # folded Q bias (zero past out_dim)

    # Shared trunk: Linear -> ReLU -> Linear -> ReLU (bf16 MXU, f32 accumulate).
    h = jnp.maximum(jnp.dot(x, w1, preferred_element_type=jnp.float32) + b1, 0.0)
    h = jnp.maximum(jnp.dot(h.astype(jnp.bfloat16), w2,
                            preferred_element_type=jnp.float32) + b2, 0.0)

    # Fused value+advantage hidden layer: cols [0:32] value, [32:64] advantage.
    hva = jnp.maximum(jnp.dot(h.astype(jnp.bfloat16), wh1,
                              preferred_element_type=jnp.float32) + bh1, 0.0)

    # Folded dueling head: lanes [0:out_dim] are Q directly (no in-kernel mean).
    q = jnp.dot(hva.astype(jnp.bfloat16), wq,
                preferred_element_type=jnp.float32) + bq     # (TB, 128)
    q_ref[...] = q[:, 0:out_dim]


# ----------------------------------------------------------------------------
# Host-side parameter packing (dueling combine folded in here)
# ----------------------------------------------------------------------------
def pack_params(p, input_dim, output_dim, dtype=jnp.bfloat16):
    """Pack all weights/biases into a single (rows, 128) blob (bf16 by default)."""
    assert output_dim <= 128, "folded head assumes output_dim <= 128"
    H, HH = HIDDEN, HEAD_HIDDEN
    in_pad, o1, o2, o3, ob, n_rows = _blob_layout(input_dim)

    blob = jnp.zeros((n_rows, 128), jnp.float32)
    # Trunk
    blob = blob.at[0:input_dim, 0:H].set(p["w1"])
    blob = blob.at[o1:o1 + H, 0:H].set(p["w2"])
    # Fused head layer 1: [wv1 | wa1]
    blob = blob.at[o2:o2 + H, 0:HH].set(p["wv1"])
    blob = blob.at[o2:o2 + H, HH:H].set(p["wa1"])
    # Folded head layer 2: Q_j = hv@wv2 + ha@(wa2[:,j]-mean_k wa2[:,k]) + b_q[j]
    wa2_centered = p["wa2"] - jnp.mean(p["wa2"], axis=1, keepdims=True)      # (32, out)
    blob = blob.at[o3:o3 + HH, 0:output_dim].set(
        jnp.broadcast_to(p["wv2"], (HH, output_dim)))
    blob = blob.at[o3 + HH:o3 + H, 0:output_dim].set(wa2_centered)
    # Biases
    bq = p["bv2"][0, 0] + (p["ba2"][0] - jnp.mean(p["ba2"][0]))              # (out,)
    blob = blob.at[ob + 0, 0:H].set(p["b1"][0])
    blob = blob.at[ob + 1, 0:H].set(p["b2"][0])
    blob = blob.at[ob + 2, 0:HH].set(p["bv1"][0])
    blob = blob.at[ob + 2, HH:H].set(p["ba1"][0])
    blob = blob.at[ob + 3, 0:output_dim].set(bq)
    return blob.astype(dtype)


# ----------------------------------------------------------------------------
# Wrapper
# ----------------------------------------------------------------------------
def dueling_q_forward(x, packed, *, input_dim, output_dim, block_batch=None):
    B = x.shape[0]
    in_pad, o1, o2, o3, ob, n_rows = _blob_layout(input_dim)
    assert packed.shape == (n_rows, 128)

    # Feature padding only when input_dim isn't already a multiple of 8.
    # The batch dim is NOT padded: Pallas partial-last-block handling covers it
    # (rows are independent; out-of-bounds output rows are masked on store).
    if input_dim != in_pad:
        x = jnp.pad(x, ((0, 0), (0, in_pad - input_dim)))

    if block_batch is None:
        # Large tiles (per-step overhead <5%) but >= 2 grid steps whenever
        # B > 8 so the "parallel" batch axis shards across both v7x TCs.
        block_batch = max(8, min(4096, _round_up(pl.cdiv(max(B, 8), 2), 8)))
    TB = block_batch
    grid = (pl.cdiv(B, TB),)

    flops = 2 * B * HIDDEN * (in_pad + HIDDEN + HIDDEN + 128)
    bytes_accessed = (B * in_pad * x.dtype.itemsize
                      + packed.size * packed.dtype.itemsize
                      + B * output_dim * 4)

    kernel = functools.partial(dueling_q_kernel, in_pad=in_pad, o1=o1, o2=o2,
                               o3=o3, ob=ob, out_dim=output_dim)
    return pl.pallas_call(
        kernel,
        out_shape=jax.ShapeDtypeStruct((B, output_dim), jnp.float32),
        grid_spec=pltpu.PrefetchScalarGridSpec(
            num_scalar_prefetch=0,
            grid=grid,
            in_specs=[
                pl.BlockSpec((TB, in_pad), lambda i: (i, 0)),
                # Constant index_map: one DMA, VMEM-resident across all steps.
                pl.BlockSpec((n_rows, 128), lambda i: (0, 0)),
            ],
            out_specs=pl.BlockSpec((TB, output_dim), lambda i: (i, 0)),
        ),
        compiler_params=pltpu.CompilerParams(dimension_semantics=("parallel",)),
        cost_estimate=pl.CostEstimate(flops=flops, transcendentals=0,
                                      bytes_accessed=bytes_accessed),
    )(x, packed)


# ----------------------------------------------------------------------------
# Init + pure-JAX f32 reference (matches PyTorch nn.Linear defaults / semantics)
# ----------------------------------------------------------------------------
def init_linear(key, fan_in, fan_out):
    kw, kb = jax.random.split(key)
    bound = 1.0 / jnp.sqrt(jnp.float32(fan_in))
    w = jax.random.uniform(kw, (fan_in, fan_out), jnp.float32, -bound, bound)
    b = jax.random.uniform(kb, (1, fan_out), jnp.float32, -bound, bound)
    return w, b


def init_params(key, input_dim, output_dim):
    keys = jax.random.split(key, 6)
    p = {}
    p["w1"], p["b1"] = init_linear(keys[0], input_dim, HIDDEN)
    p["w2"], p["b2"] = init_linear(keys[1], HIDDEN, HIDDEN)
    p["wv1"], p["bv1"] = init_linear(keys[2], HIDDEN, HEAD_HIDDEN)
    p["wv2"], p["bv2"] = init_linear(keys[3], HEAD_HIDDEN, 1)
    p["wa1"], p["ba1"] = init_linear(keys[4], HIDDEN, HEAD_HIDDEN)
    p["wa2"], p["ba2"] = init_linear(keys[5], HEAD_HIDDEN, output_dim)
    return p


def reference_forward(x, p):
    relu = lambda t: jnp.maximum(t, 0.0)
    h = relu(x @ p["w1"] + p["b1"])
    h = relu(h @ p["w2"] + p["b2"])
    v = relu(h @ p["wv1"] + p["bv1"]) @ p["wv2"] + p["bv2"]
    a = relu(h @ p["wa1"] + p["ba1"]) @ p["wa2"] + p["ba2"]
    return v + (a - a.mean(axis=1, keepdims=True))


if __name__ == "__main__":
    INPUT_DIM = 8     # state dimensionality
    OUTPUT_DIM = 4    # number of actions

    key = jax.random.PRNGKey(0)
    k_params, k_x1, k_x2 = jax.random.split(key, 3)
    params = init_params(k_params, INPUT_DIM, OUTPUT_DIM)
    packed = pack_params(params, INPUT_DIM, OUTPUT_DIM)   # bf16 blob, fold included

    # bf16 MXU operands -> compare against the f32 reference with loose tolerance.
    TOL = dict(atol=5e-2, rtol=5e-2)

    # Case 1: small batch, single grid step, no host-side copy/padding of x.
    x1 = jax.random.normal(k_x1, (8, INPUT_DIM), jnp.float32)
    q1 = jax.block_until_ready(
        dueling_q_forward(x1, packed, input_dim=INPUT_DIM, output_dim=OUTPUT_DIM))
    r1 = reference_forward(x1, params)
    assert q1.shape == (8, OUTPUT_DIM)
    assert jnp.allclose(q1, r1, **TOL), float(jnp.max(jnp.abs(q1 - r1)))

    # Case 2: batch not a multiple of the tile -> 2 grid steps (v7x TC sharding)
    # with a partial last block (no batch padding materialized host-side).
    x2 = jax.random.normal(k_x2, (20, INPUT_DIM), jnp.float32)
    q2 = jax.block_until_ready(
        dueling_q_forward(x2, packed, input_dim=INPUT_DIM, output_dim=OUTPUT_DIM))
    r2 = reference_forward(x2, params)
    assert q2.shape == (20, OUTPUT_DIM)
    assert jnp.allclose(q2, r2, **TOL), float(jnp.max(jnp.abs(q2 - r2)))

    print("KERNEL_OK")
</pallas_src>

<mosaic_0001>
module attributes {stable_mosaic.version = 11 : i64} {
  func.func @dueling_q_kernel(%arg0: i32, %arg1: memref<8x8xf32, #tpu.memory_space<vmem>>, %arg2: memref<224x128xbf16, #tpu.memory_space<vmem>>, %arg3: memref<8x4xf32, #tpu.memory_space<vmem>>) attributes {dimension_semantics = [#tpu.dimension_semantics<parallel>], iteration_bounds = array<i64: 1>, scalar_prefetch = 0 : i64, scratch_operands = 0 : i64, tpu.core_type = #tpu.core_type<tc>, window_params = [{transform_indices = @transform_0, window_bounds = array<i64: 8, 8>}, {pipeline_mode = #tpu.pipeline_mode<synchronous>, transform_indices = @transform_1, window_bounds = array<i64: 224, 128>}, {transform_indices = @transform_2, window_bounds = array<i64: 8, 4>}]} {
    %c0 = arith.constant 0 : index
    %c0_0 = arith.constant 0 : index
    %0 = vector.load %arg1[%c0, %c0_0] : memref<8x8xf32, #tpu.memory_space<vmem>>, vector<8x8xf32>
    %1 = arith.truncf %0 : vector<8x8xf32> to vector<8x8xbf16>
    %c0_1 = arith.constant 0 : index
    %c0_2 = arith.constant 0 : index
    %2 = vector.load %arg2[%c0_1, %c0_2] : memref<224x128xbf16, #tpu.memory_space<vmem>>, vector<8x64xbf16>
    %c16 = arith.constant 16 : index
    %c0_3 = arith.constant 0 : index
    %3 = vector.load %arg2[%c16, %c0_3] : memref<224x128xbf16, #tpu.memory_space<vmem>>, vector<64x64xbf16>
    %c80 = arith.constant 80 : index
    %c0_4 = arith.constant 0 : index
    %4 = vector.load %arg2[%c80, %c0_4] : memref<224x128xbf16, #tpu.memory_space<vmem>>, vector<64x64xbf16>
    %c144 = arith.constant 144 : index
    %c0_5 = arith.constant 0 : index
    %5 = vector.load %arg2[%c144, %c0_5] : memref<224x128xbf16, #tpu.memory_space<vmem>>, vector<64x128xbf16>
    %c208 = arith.constant 208 : index
    %c0_6 = arith.constant 0 : index
    %6 = vector.load %arg2[%c208, %c0_6] : memref<224x128xbf16, #tpu.memory_space<vmem>>, vector<8x128xbf16>
    %7 = arith.extf %6 : vector<8x128xbf16> to vector<8x128xf32>
    %8 = vector.extract_strided_slice %7 {offsets = [0, 0], sizes = [1, 64], strides = [1, 1]} : vector<8x128xf32> to vector<1x64xf32>
    %9 = vector.extract_strided_slice %7 {offsets = [1, 0], sizes = [1, 64], strides = [1, 1]} : vector<8x128xf32> to vector<1x64xf32>
    %10 = vector.extract_strided_slice %7 {offsets = [2, 0], sizes = [1, 64], strides = [1, 1]} : vector<8x128xf32> to vector<1x64xf32>
    %11 = vector.extract_strided_slice %7 {offsets = [3, 0], sizes = [1, 128], strides = [1, 1]} : vector<8x128xf32> to vector<1x128xf32>
    %cst = arith.constant dense<0.000000e+00> : vector<8x64xf32>
    %12 = tpu.matmul %1, %2, %cst {dimension_numbers = #tpu.dot_dimension_numbers<[1], [0], [0], [1], [0, 0, 1, 1], [], []>} : vector<8x8xbf16>, vector<8x64xbf16>, vector<8x64xf32> -> vector<8x64xf32>
    %13 = vector.broadcast %8 : vector<1x64xf32> to vector<8x64xf32>
    %14 = arith.addf %12, %13 : vector<8x64xf32>
    %cst_7 = arith.constant 0.000000e+00 : f32
    %15 = vector.broadcast %cst_7 : f32 to vector<8x64xf32>
    %16 = arith.maximumf %14, %15 : vector<8x64xf32>
    %17 = arith.truncf %16 : vector<8x64xf32> to vector<8x64xbf16>
    %cst_8 = arith.constant dense<0.000000e+00> : vector<8x64xf32>
    %18 = tpu.matmul %17, %3, %cst_8 {dimension_numbers = #tpu.dot_dimension_numbers<[1], [0], [0], [1], [0, 0, 1, 1], [], []>} : vector<8x64xbf16>, vector<64x64xbf16>, vector<8x64xf32> -> vector<8x64xf32>
    %19 = vector.broadcast %9 : vector<1x64xf32> to vector<8x64xf32>
    %20 = arith.addf %18, %19 : vector<8x64xf32>
    %cst_9 = arith.constant 0.000000e+00 : f32
    %21 = vector.broadcast %cst_9 : f32 to vector<8x64xf32>
    %22 = arith.maximumf %20, %21 : vector<8x64xf32>
    %23 = arith.truncf %22 : vector<8x64xf32> to vector<8x64xbf16>
    %cst_10 = arith.constant dense<0.000000e+00> : vector<8x64xf32>
    %24 = tpu.matmul %23, %4, %cst_10 {dimension_numbers = #tpu.dot_dimension_numbers<[1], [0], [0], [1], [0, 0, 1, 1], [], []>} : vector<8x64xbf16>, vector<64x64xbf16>, vector<8x64xf32> -> vector<8x64xf32>
    %25 = vector.broadcast %10 : vector<1x64xf32> to vector<8x64xf32>
    %26 = arith.addf %24, %25 : vector<8x64xf32>
    %cst_11 = arith.constant 0.000000e+00 : f32
    %27 = vector.broadcast %cst_11 : f32 to vector<8x64xf32>
    %28 = arith.maximumf %26, %27 : vector<8x64xf32>
    %29 = arith.truncf %28 : vector<8x64xf32> to vector<8x64xbf16>
    %cst_12 = arith.constant dense<0.000000e+00> : vector<8x128xf32>
    %30 = tpu.matmul %29, %5, %cst_12 {dimension_numbers = #tpu.dot_dimension_numbers<[1], [0], [0], [1], [0, 0, 1, 1], [], []>} : vector<8x64xbf16>, vector<64x128xbf16>, vector<8x128xf32> -> vector<8x128xf32>
    %31 = vector.broadcast %11 : vector<1x128xf32> to vector<8x128xf32>
    %32 = arith.addf %30, %31 : vector<8x128xf32>
    %33 = vector.extract_strided_slice %32 {offsets = [0, 0], sizes = [8, 4], strides = [1, 1]} : vector<8x128xf32> to vector<8x4xf32>
    %c0_13 = arith.constant 0 : index
    %c0_14 = arith.constant 0 : index
    %34 = vector.load %arg3[%c0_13, %c0_14] : memref<8x4xf32, #tpu.memory_space<vmem>>, vector<8x4xf32>
    tpu.vector_store %arg3[%c0_13, %c0_14], %33 {strides = array<i32>} : memref<8x4xf32, #tpu.memory_space<vmem>>, vector<8x4xf32>,
    return
  }
  func.func @transform_0(%arg0: i32) -> (i32, i32) {
    %c0_i32 = arith.constant 0 : i32
    %c0_i32_0 = arith.constant 0 : i32
    return %arg0, %c0_i32 : i32, i32
  }
  func.func @transform_1(%arg0: i32) -> (i32, i32) {
    %c0_i32 = arith.constant 0 : i32
    %c0_i32_0 = arith.constant 0 : i32
    %c0_i32_1 = arith.constant 0 : i32
    return %c0_i32, %c0_i32_0 : i32, i32
  }
  func.func @transform_2(%arg0: i32) -> (i32, i32) {
    %c0_i32 = arith.constant 0 : i32
    %c0_i32_0 = arith.constant 0 : i32
    return %arg0, %c0_i32 : i32, i32
  }
}

</mosaic_0001>

<bundles_post_ra>
// kernel: tpu_custom_call.1
= control target key start
LH: loop header
LB: loop body
LE: loop exit
PB: predicated region body
PF: predicated region fallthrough
CT: control target
= control target key end

     0   :  { %7 = vsyncpa [#allocation3], 0  ;;  %s567_s0 = inlined_call_operand.hbm [shape: f32[8,8], index: 0, kind: input, shape index: {}]   ;;  %s568_s1 = inlined_call_operand.hbm [shape: bf16[224,128], index: 1, kind: input, shape index: {}]   ;;  %s569_s2 = inlined_call_operand.vmem [shape: f32[8,4], index: 2, kind: output, shape index: {}]  }
   0x1   :  { %8 = vsyncpa [#allocation5], 0  ;;  %s488_s9 = smov [#allocation2]   ;;  %s489_s11 = smov [#allocation4]  }
   0x2   :  { %s15_s10 = sshll.u32 %s488_s9, 4  ;;  %s24_s12 = sshll.u32 %s489_s11, 4  ;;  %s16_s10 = int_to_ptr.vmem [resolvable:$true] %s15_s10  ;;  %s509_s12 = int_to_ptr.vmem [resolvable:$true] %s24_s12 }
   0x3   :  { %s440_s15 = scalar_lea.hbm %s567_s0, 128 }
   0x4   :  { %p441_p0 = scmp.ne.s32.totalorder %s567_s0, %s440_s15  ;;  %p444_p1 = scmp.lt.u32.totalorder %s440_s15, %s567_s0 }
   0x6   :  { %p446_p2 = pnand %p444_p1, %p441_p0 }
   0x8   :  { %449 = shalt.err (!%p446_p2)
}
   0x9   :  { %s450_s20 = scalar_lea.vmem %s16_s10, 128  ;;  %p455_p4 = scmp.lt.s32.totalorder %s16_s10, %s16_s10 }
   0xa   :  { %p451_p3 = scmp.ne.s32.totalorder %s16_s10, %s450_s20  ;;  %p456_p5 = scmp.lt.s32.totalorder %s450_s20, %s450_s20 }
   0xc   :  { %p457_p6 = por %p456_p5, %p455_p4 }
   0xe   :  { %p458_p7 = pnand %p457_p6, %p451_p3 }
  0x10   :  { %461 = shalt.err (!%p458_p7)
}
  0x11   :  { %18 = dma.hbm_to_vmem [thread:$0]  %s567_s0, 128, %s16_s10, [#allocation3]  }
  0x12   :  { %s462_s25 = scalar_lea.hbm %s568_s1, 1792 }
  0x13   :  { %p463_p8 = scmp.ne.s32.totalorder %s568_s1, %s462_s25  ;;  %p466_p9 = scmp.lt.u32.totalorder %s462_s25, %s568_s1 }
  0x15   :  { %p468_p10 = pnand %p466_p9, %p463_p8 }
  0x17   :  { %471 = shalt.err (!%p468_p10)
}
  0x18   :  { %s472_s30 = scalar_lea.vmem %s509_s12, 1792  ;;  %p477_p12 = scmp.lt.s32.totalorder %s509_s12, %s509_s12 }
  0x19   :  { %p473_p11 = scmp.ne.s32.totalorder %s509_s12, %s472_s30  ;;  %p478_p13 = scmp.lt.s32.totalorder %s472_s30, %s472_s30 }
  0x1b   :  { %p479_p0 = por %p478_p13, %p477_p12 }
  0x1d   :  { %p480_p1 = pnand %p479_p0, %p473_p11 }
  0x1f   :  { %483 = shalt.err (!%p480_p1)
}
  0x20   :  { %s490_s0 = smov 64   ;;  %s491_s3 = smov 4  }
  0x21   :  { %30 = dma.hbm_to_vmem [thread:$0]  %s568_s1, 1792, %s509_s12, [#allocation5], %s490_s0, %s490_s0, %s491_s3  }
  0x22   :  { %484 = dma.done.wait [#allocation3], 128  }
  0x23   :  { %485 = vsyncadd [#allocation3], 4294967168 }
  0x24   :  { %486 = dma.done.wait [#allocation5], 1792  }
  0x25   :  { %487 = vsyncadd [#allocation5], 4294965504  ;;  %v492_v0 = vmov 0.0   ;;  %vm493_vm0 = vmmov 0   ;;  %vm75_vm1 = vcmask 1043456   ;;  %v38_v2 = vld [vmem:[#allocation2] sm:$0xff]  ;;  %v67_v11 = vlaneseq }
  0x26   :  { %380 = vmatprep.subr.bf16.mxu0 %v492_v0  ;;  %382 = vmatprep.mubr.msk.bf16.mxu0 %vm493_vm0, %v492_v0  ;;  %v40_v1 = vld [vmem:[#allocation4] sm:$0xf]  ;;  %v39_v4 = vpack.c.bf16 %v38_v2, %v38_v2  ;;  %v428_v5 = vld [vmem:[#allocation4 + $0x8] sm:$0xff]   ;;  %vm71_vm2 = vcmask 64512   ;;  %v429_v6 = vld [vmem:[#allocation4 + $0x10] sm:$0xff]   ;;  %vm149_vm3 = vcmask 523264  }
  0x27   :  { %386 = vmatprep.subr.bf16.mxu1 %v492_v0  ;;  %394 = vmatprep.mubr.msk.bf16.mxu1 %vm493_vm0, %v492_v0  ;;  %v77_v3 = vsel %vm75_vm1, %v40_v1, 0  ;;  %v430_v7 = vld [vmem:[#allocation4 + $0x18] sm:$0xff]   ;;  %v431_v8 = vld [vmem:[#allocation4 + $0x20] sm:$0xff]   ;;  %v432_v9 = vld [vmem:[#allocation4 + $0x28] sm:$0xff]   ;;  %v68_v12 = vshrl.u32 %v67_v11, 7  ;;  %vm339_vm4 = vcmask 31744  }
  0x28   :  { %381 = vmatpush3.bf16.msra.mxu0 %v77_v3  ;;  %387 = vmatpush3.bf16.msra.mxu1 %v428_v5  ;;  %v433_v10 = vld [vmem:[#allocation4 + $0x30] sm:$0xff]   ;;  %v65_v13 = vld [vmem:[#allocation4 + $0x68] sm:$0xf]  ;;  %v434_v24 = vld [vmem:[#allocation4 + $0x38] sm:$0xff]  }
  0x29   :  { %398 = vmatprep.subr.bf16.mxu0 %v492_v0  ;;  %388 = vmatprep.subr.bf16.mxu1 %v492_v0  ;;  %v66_v14 = vunpack.c.l.bf16 %v65_v13  ;;  %v69_v15 = vsub.s32 0, %v68_v12  ;;  %v435_v25 = vld [vmem:[#allocation4 + $0x40] sm:$0xff]   ;;  %v436_v26 = vld [vmem:[#allocation4 + $0x48] sm:$0xff]   ;;  %v437_v27 = vld [vmem:[#allocation4 + $0x50] sm:$0xff]   ;;  %v123_v28 = vsub.s32 1, %v68_v12  ;;  %v197_v39 = vsub.s32 2, %v68_v12 }
  0x2a   :  { %v438_v37 = vld [vmem:[#allocation4 + $0x58] sm:$0xff]   ;;  %v439_v38 = vld [vmem:[#allocation4 + $0x60] sm:$0xff]   ;;  %v270_v48 = vsub.s32 3, %v68_v12 }
  0x2b   :  { %383 = vmatmul.mubr.msk.bf16.vlgmr.msra.gmra.mrb[0].mxu0 %vm71_vm2, %v39_v4  ;;  %v70_v16 = vrot.slane %v66_v14, %v69_v15  ;;  %v124_v29 = vrot.slane %v66_v14, %v123_v28  ;;  %v198_v40 = vrot.slane %v66_v14, %v197_v39 }
  0x2c   :  { %406 = vmatprep.mubr.msk.bf16.mxu0 %vm493_vm0, %v492_v0  ;;  %389 = vmatpush3.bf16.msra.mxu1 %v429_v6  ;;  %v271_v49 = vrot.slane %v66_v14, %v270_v48 }
  0x2d   :  { %390 = vmatprep.subr.bf16.mxu1 %v492_v0  ;;  %399 = vmatpush3.bf16.msra.mxu0 %v432_v9 }
  0x2e   :  { %400 = vmatprep.subr.bf16.mxu0 %v492_v0 }
  0x30   :  { %391 = vmatpush3.bf16.msra.mxu1 %v430_v7 }
  0x31   :  { %392 = vmatprep.subr.bf16.mxu1 %v492_v0  ;;  %401 = vmatpush3.bf16.msra.mxu0 %v433_v10 }
  0x32   :  { %402 = vmatprep.subr.bf16.mxu0 %v492_v0 }
  0x34   :  { %393 = vmatpush3.bf16.msra.mxu1 %v431_v8 }
  0x35   :  { %410 = vmatprep.subr.bf16.mxu1 %v492_v0  ;;  %403 = vmatpush3.bf16.msra.mxu0 %v434_v24 }
  0x36   :  { %404 = vmatprep.subr.bf16.mxu0 %v492_v0 }
  0x39   :  { %405 = vmatpush3.bf16.msra.mxu0 %v435_v25 }
  0xfe   :  { %v113_v17 = vpop.f32.mrb[0].mxu0 }
  0xff   :  { %v114_v18 = vadd.f32 %v113_v17, %v70_v16  ;;  %v384_v19 = vpop.f32.mrb[1].mxu0 }
 0x100   :  { %v116_v20 = vpop.f32.mrb[2].mxu0 }
 0x101   :  { %v119_v21 = vmax.f32 %v114_v18, 0.0  ;;  %v385_v22 = vpop.f32.mrb[3].mxu0 }
 0x103   :  { %v120_v23 = vpack.c.bf16 %v119_v21, %v119_v21 }
 0x105   :  { %395 = vmatmul.mubr.msk.bf16.vlgmr.msra.gmra.mrb[0].mxu1 %vm149_vm3, %v120_v23 }
 0x106   :  { %418 = vmatprep.mubr.msk.bf16.mxu1 %vm493_vm0, %v492_v0  ;;  %411 = vmatpush3.bf16.msra.mxu1 %v436_v26 }
 0x107   :  { %412 = vmatprep.subr.bf16.mxu1 %v492_v0 }
 0x10a   :  { %413 = vmatpush3.bf16.msra.mxu1 %v437_v27 }
 0x10b   :  { %414 = vmatprep.subr.bf16.mxu1 %v492_v0 }
 0x10e   :  { %415 = vmatpush3.bf16.msra.mxu1 %v438_v37 }
 0x10f   :  { %416 = vmatprep.subr.bf16.mxu1 %v492_v0 }
 0x112   :  { %417 = vmatpush3.bf16.msra.mxu1 %v439_v38 }
 0x1d8   :  { %v187_v30 = vpop.f32.mrb[0].mxu1 }
 0x1d9   :  { %v188_v31 = vadd.f32 %v187_v30, %v124_v29  ;;  %v396_v32 = vpop.f32.mrb[1].mxu1 }
 0x1da   :  { %v190_v33 = vpop.f32.mrb[2].mxu1 }
 0x1db   :  { %v193_v34 = vmax.f32 %v188_v31, 0.0  ;;  %v397_v35 = vpop.f32.mrb[3].mxu1 }
 0x1dd   :  { %v194_v36 = vpack.c.bf16 %v193_v34, %v193_v34 }
 0x1df   :  { %407 = vmatmul.mubr.msk.bf16.vlgmr.msra.gmra.mrb[4].mxu0 %vm149_vm3, %v194_v36 }
 0x2b2   :  { %v260_v41 = vpop.f32.mrb[4].mxu0 }
 0x2b3   :  { %v261_v42 = vadd.f32 %v260_v41, %v198_v40  ;;  %v408_v43 = vpop.f32.mrb[5].mxu0 }
 0x2b4   :  { %v263_v44 = vpop.f32.mrb[6].mxu0 }
 0x2b5   :  { %v266_v45 = vmax.f32 %v261_v42, 0.0  ;;  %v409_v46 = vpop.f32.mrb[7].mxu0 }
 0x2b7   :  { %v267_v47 = vpack.c.bf16 %v266_v45, %v266_v45 }
 0x2b9   :  { %419 = vmatmul.mubr.msk.bf16.vlgmr.msra.gmra.mrb[4].mxu1 %vm149_vm3, %v267_v47 }
 0x38c   :  { %v333_v50 = vpop.f32.mrb[4].mxu1 }
 0x38d   :  { %v334_v51 = vadd.f32 %v333_v50, %v271_v49  ;;  %v420_v52 = vpop.f32.mrb[5].mxu1 }
 0x38e   :  { %v336_v53 = vpop.f32.mrb[6].mxu1 }
 0x38f   :  { %340 = vst.msk [vmem:[%s569_s2] sm:$0xff] %vm339_vm4, %v334_v51  ;;  %v421_v54 = vpop.f32.mrb[7].mxu1 }
 0x390   :  { %345 = vsyncpa [#allocation3], 1 }
 0x391   :  { %346 = vsyncpa [#allocation5], 1 }

</bundles_post_ra>
